<compile_context>
chip_gen: v5e
topology: v5e:2x2
jax: 0.10.0
libtpu: 0.0.40
codegen_flags: <defaults>
</compile_context>

<pallas_src>
import functools

import jax
import jax.numpy as jnp
from jax.experimental import pallas as pl
from jax.experimental.pallas import tpu as pltpu


# ----------------------------------------------------------------------------
# Fused kernel: encoder -> (project) -> decoder -> per-sample recon MSE
# ----------------------------------------------------------------------------
def _nae_fused_kernel(x_ref, we1_ref, be1_ref, we2_ref, be2_ref,
                      wd1_ref, bd1_ref, wd2_ref, bd2_ref, o_ref, *, spherical):
    x = x_ref[...]                                                 # (M, D) f32
    # encoder
    h = jnp.dot(x, we1_ref[...], preferred_element_type=jnp.float32) + be1_ref[...]
    h = jnp.maximum(h, 0.0)
    z = jnp.dot(h, we2_ref[...], preferred_element_type=jnp.float32) + be2_ref[...]
    # project (NAE_L2_base.project): identity unless spherical=True
    if spherical:
        z = z / jnp.sqrt(jnp.sum(z * z, axis=-1, keepdims=True))
    # decoder
    g = jnp.dot(z, wd1_ref[...], preferred_element_type=jnp.float32) + bd1_ref[...]
    g = jnp.maximum(g, 0.0)
    recon = jnp.dot(g, wd2_ref[...], preferred_element_type=jnp.float32) + bd2_ref[...]
    # per-sample reconstruction error: ((x - recon)**2).mean(dim=-1)
    diff = x - recon
    o_ref[...] = jnp.mean(diff * diff, axis=-1, keepdims=True)     # (M, 1)


def nae_forward(params, x_nchw, *, spherical=False):
    """NAE_L2_base.forward(x): per-sample reconstruction MSE, shape (B,)."""
    B = x_nchw.shape[0]
    D = x_nchw.shape[1] * x_nchw.shape[2] * x_nchw.shape[3]
    assert params["we1"].shape[0] == D
    x_flat = x_nchw.reshape(B, D).astype(jnp.float32)

    # Pad batch to a multiple of 8 sublanes (padded rows sliced off below).
    M = max(8, ((B + 7) // 8) * 8)
    if M != B:
        x_flat = jnp.pad(x_flat, ((0, M - B), (0, 0)))

    kernel = functools.partial(_nae_fused_kernel, spherical=spherical)
    vmem = pl.BlockSpec(memory_space=pltpu.MemorySpace.VMEM)
    out = pl.pallas_call(
        kernel,
        out_shape=jax.ShapeDtypeStruct((M, 1), jnp.float32),
        in_specs=[vmem] * 9,
        out_specs=vmem,
    )(x_flat,
      params["we1"], params["be1"], params["we2"], params["be2"],
      params["wd1"], params["bd1"], params["wd2"], params["bd2"])
    return out[:B, 0]                                              # (B,)


# ----------------------------------------------------------------------------
# Parameters (deterministic): MLP encoder / decoder, PyTorch-Linear-like init
# ----------------------------------------------------------------------------
def init_params(key, d_in=1024, hidden=128, z_dim=32):
    def lin(k, fan_in, fan_out):
        kw, kb = jax.random.split(k)
        s = 1.0 / jnp.sqrt(jnp.float32(fan_in))
        w = jax.random.uniform(kw, (fan_in, fan_out), jnp.float32, -s, s)
        b = jax.random.uniform(kb, (1, fan_out), jnp.float32, -s, s)
        return w, b

    k1, k2, k3, k4 = jax.random.split(key, 4)
    p = {}
    p["we1"], p["be1"] = lin(k1, d_in, hidden)      # encoder Linear(1024, 128)
    p["we2"], p["be2"] = lin(k2, hidden, z_dim)     # encoder Linear(128, 32)
    p["wd1"], p["bd1"] = lin(k3, z_dim, hidden)     # decoder Linear(32, 128)
    p["wd2"], p["bd2"] = lin(k4, hidden, d_in)      # decoder Linear(128, 1024)
    p["T_"] = jnp.array(0.0, dtype=jnp.float32)     # log T buffer (unused in forward)
    return p


# ----------------------------------------------------------------------------
# Pure-jnp reference for a sanity check
# ----------------------------------------------------------------------------
def nae_forward_ref(params, x_nchw, *, spherical=False):
    B = x_nchw.shape[0]
    x = x_nchw.reshape(B, -1).astype(jnp.float32)
    h = jnp.maximum(x @ params["we1"] + params["be1"], 0.0)
    z = h @ params["we2"] + params["be2"]
    if spherical:
        z = z / jnp.sqrt(jnp.sum(z * z, axis=-1, keepdims=True))
    g = jnp.maximum(z @ params["wd1"] + params["bd1"], 0.0)
    recon = g @ params["wd2"] + params["bd2"]
    return jnp.mean((x - recon) ** 2, axis=-1)


if __name__ == "__main__":
    B, C, H, W = 2, 4, 16, 16
    key = jax.random.PRNGKey(0)
    kx, kp = jax.random.split(key)
    x = jax.random.normal(kx, (B, C, H, W), dtype=jnp.float32)
    params = init_params(kp, d_in=C * H * W, hidden=128, z_dim=32)

    energy = jax.jit(nae_forward)(params, x)
    energy = jax.block_until_ready(energy)

    ref = nae_forward_ref(params, x)
    assert energy.shape == (B,)
    assert jnp.allclose(energy, ref, atol=1e-3, rtol=1e-3), (energy, ref)

    print("KERNEL_OK")
</pallas_src>

<mosaic_0001>
module attributes {stable_mosaic.version = 11 : i64} {
  func.func @_nae_fused_kernel(%arg0: memref<8x1024xf32, #tpu.memory_space<vmem>>, %arg1: memref<1024x128xf32, #tpu.memory_space<vmem>>, %arg2: memref<1x128xf32, #tpu.memory_space<vmem>>, %arg3: memref<128x32xf32, #tpu.memory_space<vmem>>, %arg4: memref<1x32xf32, #tpu.memory_space<vmem>>, %arg5: memref<32x128xf32, #tpu.memory_space<vmem>>, %arg6: memref<1x128xf32, #tpu.memory_space<vmem>>, %arg7: memref<128x1024xf32, #tpu.memory_space<vmem>>, %arg8: memref<1x1024xf32, #tpu.memory_space<vmem>>, %arg9: memref<8x1xf32, #tpu.memory_space<vmem>>) attributes {dimension_semantics = [], scalar_prefetch = 0 : i64, scratch_operands = 0 : i64, tpu.core_type = #tpu.core_type<tc>} {
    %c0 = arith.constant 0 : index
    %c0_0 = arith.constant 0 : index
    %0 = vector.load %arg0[%c0, %c0_0] : memref<8x1024xf32, #tpu.memory_space<vmem>>, vector<8x1024xf32>
    %c0_1 = arith.constant 0 : index
    %c0_2 = arith.constant 0 : index
    %1 = vector.load %arg1[%c0_1, %c0_2] : memref<1024x128xf32, #tpu.memory_space<vmem>>, vector<1024x128xf32>
    %cst = arith.constant dense<0.000000e+00> : vector<8x128xf32>
    %2 = tpu.matmul %0, %1, %cst {dimension_numbers = #tpu.dot_dimension_numbers<[1], [0], [0], [1], [0, 0, 1, 1], [], []>} : vector<8x1024xf32>, vector<1024x128xf32>, vector<8x128xf32> -> vector<8x128xf32>
    %c0_3 = arith.constant 0 : index
    %c0_4 = arith.constant 0 : index
    %3 = vector.load %arg2[%c0_3, %c0_4] : memref<1x128xf32, #tpu.memory_space<vmem>>, vector<1x128xf32>
    %4 = vector.broadcast %3 : vector<1x128xf32> to vector<8x128xf32>
    %5 = arith.addf %2, %4 : vector<8x128xf32>
    %cst_5 = arith.constant 0.000000e+00 : f32
    %6 = vector.broadcast %cst_5 : f32 to vector<8x128xf32>
    %7 = arith.maximumf %5, %6 : vector<8x128xf32>
    %c0_6 = arith.constant 0 : index
    %c0_7 = arith.constant 0 : index
    %8 = vector.load %arg3[%c0_6, %c0_7] : memref<128x32xf32, #tpu.memory_space<vmem>>, vector<128x32xf32>
    %cst_8 = arith.constant dense<0.000000e+00> : vector<8x32xf32>
    %9 = tpu.matmul %7, %8, %cst_8 {dimension_numbers = #tpu.dot_dimension_numbers<[1], [0], [0], [1], [0, 0, 1, 1], [], []>} : vector<8x128xf32>, vector<128x32xf32>, vector<8x32xf32> -> vector<8x32xf32>
    %c0_9 = arith.constant 0 : index
    %c0_10 = arith.constant 0 : index
    %10 = vector.load %arg4[%c0_9, %c0_10] : memref<1x32xf32, #tpu.memory_space<vmem>>, vector<1x32xf32>
    %11 = vector.broadcast %10 : vector<1x32xf32> to vector<8x32xf32>
    %12 = arith.addf %9, %11 : vector<8x32xf32>
    %c0_11 = arith.constant 0 : index
    %c0_12 = arith.constant 0 : index
    %13 = vector.load %arg5[%c0_11, %c0_12] : memref<32x128xf32, #tpu.memory_space<vmem>>, vector<32x128xf32>
    %cst_13 = arith.constant dense<0.000000e+00> : vector<8x128xf32>
    %14 = tpu.matmul %12, %13, %cst_13 {dimension_numbers = #tpu.dot_dimension_numbers<[1], [0], [0], [1], [0, 0, 1, 1], [], []>} : vector<8x32xf32>, vector<32x128xf32>, vector<8x128xf32> -> vector<8x128xf32>
    %c0_14 = arith.constant 0 : index
    %c0_15 = arith.constant 0 : index
    %15 = vector.load %arg6[%c0_14, %c0_15] : memref<1x128xf32, #tpu.memory_space<vmem>>, vector<1x128xf32>
    %16 = vector.broadcast %15 : vector<1x128xf32> to vector<8x128xf32>
    %17 = arith.addf %14, %16 : vector<8x128xf32>
    %cst_16 = arith.constant 0.000000e+00 : f32
    %18 = vector.broadcast %cst_16 : f32 to vector<8x128xf32>
    %19 = arith.maximumf %17, %18 : vector<8x128xf32>
    %c0_17 = arith.constant 0 : index
    %c0_18 = arith.constant 0 : index
    %20 = vector.load %arg7[%c0_17, %c0_18] : memref<128x1024xf32, #tpu.memory_space<vmem>>, vector<128x1024xf32>
    %cst_19 = arith.constant dense<0.000000e+00> : vector<8x1024xf32>
    %21 = tpu.matmul %19, %20, %cst_19 {dimension_numbers = #tpu.dot_dimension_numbers<[1], [0], [0], [1], [0, 0, 1, 1], [], []>} : vector<8x128xf32>, vector<128x1024xf32>, vector<8x1024xf32> -> vector<8x1024xf32>
    %c0_20 = arith.constant 0 : index
    %c0_21 = arith.constant 0 : index
    %22 = vector.load %arg8[%c0_20, %c0_21] : memref<1x1024xf32, #tpu.memory_space<vmem>>, vector<1x1024xf32>
    %23 = vector.broadcast %22 : vector<1x1024xf32> to vector<8x1024xf32>
    %24 = arith.addf %21, %23 : vector<8x1024xf32>
    %25 = arith.subf %0, %24 : vector<8x1024xf32>
    %26 = arith.mulf %25, %25 : vector<8x1024xf32>
    %cst_22 = arith.constant dense<0.000000e+00> : vector<8xf32>
    %27 = vector.multi_reduction <add>, %26, %cst_22 [1] : vector<8x1024xf32> to vector<8xf32>
    %28 = vector.shape_cast %27 : vector<8xf32> to vector<8x1xf32>
    %cst_23 = arith.constant 1.024000e+03 : f32
    %29 = vector.broadcast %cst_23 : f32 to vector<8x1xf32>
    %30 = arith.divf %28, %29 : vector<8x1xf32>
    %c0_24 = arith.constant 0 : index
    %c0_25 = arith.constant 0 : index
    %31 = vector.load %arg9[%c0_24, %c0_25] : memref<8x1xf32, #tpu.memory_space<vmem>>, vector<8x1xf32>
    tpu.vector_store %arg9[%c0_24, %c0_25], %30 {strides = array<i32>} : memref<8x1xf32, #tpu.memory_space<vmem>>, vector<8x1xf32>,
    return
  }
}

</mosaic_0001>

<bundles_post_ra>
// kernel: nae_forward.1
= control target key start
LH: loop header
LB: loop body
LE: loop exit
PB: predicated region body
PF: predicated region fallthrough
CT: control target
= control target key end

     0   :  { %14 = vsyncpa [#allocation3], 0  ;;  %s1044_s0 = inlined_call_operand.vmem [shape: f32[8,1024], index: 0, kind: input, shape index: {}]   ;;  %s1045_s1 = inlined_call_operand.hbm [shape: f32[1024,128], index: 1, kind: input, shape index: {}]   ;;  %s1046_s2 = inlined_call_operand.vmem [shape: f32[1,128], index: 2, kind: input, shape index: {}]   ;;  %s1047_s3 = inlined_call_operand.vmem [shape: f32[128,32], index: 3, kind: input, shape index: {}]   ;;  %s1048_s4 = inlined_call_operand.vmem [shape: f32[1,32], index: 4, kind: input, shape index: {}]   ;;  %s1049_s5 = inlined_call_operand.vmem [shape: f32[32,128], index: 5, kind: input, shape index: {}]   ;;  %s1050_s6 = inlined_call_operand.vmem [shape: f32[1,128], index: 6, kind: input, shape index: {}]   ;;  %s1051_s7 = inlined_call_operand.hbm [shape: f32[128,1024], index: 7, kind: input, shape index: {}]   ;;  %s1052_s8 = inlined_call_operand.vmem [shape: f32[1,1024], index: 8, kind: input, shape index: {}]   ;;  %s1053_s9 = inlined_call_operand.vmem [shape: f32[8,1], index: 9, kind: output, shape index: {}]  }
   0x1   :  { %s22_s11 = sshll.u32 %s1045_s1, 4  ;;  %s23_s11 = int_to_ptr.hbm [resolvable:$true] %s22_s11 }
   0x2   :  { %15 = vsyncpa [#allocation5], 0  ;;  %s850_s12 = smov [#allocation2]   ;;  %s45_s16 = sshll.u32 %s1051_s7, 4  ;;  %s46_s16 = int_to_ptr.hbm [resolvable:$true] %s45_s16 }
   0x3   :  { %s24_s13 = sshll.u32 %s850_s12, 4  ;;  %s851_s17 = smov 128   ;;  %s25_s13 = int_to_ptr.vmem [resolvable:$true] %s24_s13 }
   0x4   :  { %s852_s18 = smov 8   ;;  %s853_s19 = smov [#allocation4]  }
   0x5   :  { %30 = dma.hbm_to_vmem [thread:$0]  %s23_s11, 16384, %s25_s13, [#allocation3], %s851_s17, %s851_s17, %s852_s18  }
   0x6   :  { %s47_s20 = sshll.u32 %s853_s19, 4  ;;  %s854_s21 = smov 1024   ;;  %s48_s20 = int_to_ptr.vmem [resolvable:$true] %s47_s20 }
   0x7   :  { %s855_s22 = smov 64  }
   0x8   :  { %53 = dma.hbm_to_vmem [thread:$0]  %s46_s16, 16384, %s48_s20, [#allocation5], %s854_s21, %s854_s21, %s855_s22  }
   0x9   :  { %846 = dma.done.wait [#allocation3], 16384  }
   0xa   :  { %847 = vsyncadd [#allocation3], 4294950912 }
   0xb   :  { %848 = dma.done.wait [#allocation5], 16384  }
   0xc   :  { %849 = vsyncadd [#allocation5], 4294950912  ;;  %v119_v0 = vld [vmem:[#allocation2 + $0x178] sm:$0xff]  ;;  %v118_v2 = vld [vmem:[#allocation2 + $0x170] sm:$0xff]  ;;  %vm413_vm0 = vcmask 261120   ;;  %vm777_vm2 = vcmask 7168  }
   0xd   :  { %v87_v1 = vld [vmem:[#allocation2 + $0x78] sm:$0xff]  ;;  %244 = vmatpush.msra.mxu2 %v119_v0  ;;  %v86_v4 = vld [vmem:[#allocation2 + $0x70] sm:$0xff]  ;;  %v117_v6 = vld [vmem:[#allocation2 + $0x168] sm:$0xff] }
   0xe   :  { %204 = vmatpush.msra.mxu0 %v87_v1  ;;  %v135_v3 = vld [vmem:[#allocation2 + $0x1f8] sm:$0xff]  ;;  %v134_v7 = vld [vmem:[#allocation2 + $0x1f0] sm:$0xff]  ;;  %v85_v8 = vld [vmem:[#allocation2 + $0x68] sm:$0xff] }
   0xf   :  { %v103_v5 = vld [vmem:[#allocation2 + $0xf8] sm:$0xff]  ;;  %264 = vmatpush.msra.mxu3 %v135_v3  ;;  %245 = vmatpush.msra.mxu2 %v118_v2  ;;  %v102_v9 = vld [vmem:[#allocation2 + $0xf0] sm:$0xff]  ;;  %v133_v10 = vld [vmem:[#allocation2 + $0x1e8] sm:$0xff] }
  0x10   :  { %224 = vmatpush.msra.mxu1 %v103_v5  ;;  %205 = vmatpush.msra.mxu0 %v86_v4  ;;  %v116_v11 = vld [vmem:[#allocation2 + $0x160] sm:$0xff]  ;;  %v101_v13 = vld [vmem:[#allocation2 + $0xe8] sm:$0xff]  ;;  %v115_v16 = vld [vmem:[#allocation2 + $0x158] sm:$0xff] }
  0x11   :  { %265 = vmatpush.msra.mxu3 %v134_v7  ;;  %v84_v12 = vld [vmem:[#allocation2 + $0x60] sm:$0xff]  ;;  %246 = vmatpush.msra.mxu2 %v117_v6  ;;  %v83_v17 = vld [vmem:[#allocation2 + $0x58] sm:$0xff]  ;;  %v114_v20 = vld [vmem:[#allocation2 + $0x150] sm:$0xff] }
  0x12   :  { %225 = vmatpush.msra.mxu1 %v102_v9  ;;  %206 = vmatpush.msra.mxu0 %v85_v8  ;;  %v132_v14 = vld [vmem:[#allocation2 + $0x1e0] sm:$0xff]  ;;  %v131_v18 = vld [vmem:[#allocation2 + $0x1d8] sm:$0xff]  ;;  %v82_v21 = vld [vmem:[#allocation2 + $0x50] sm:$0xff] }
  0x13   :  { %v100_v15 = vld [vmem:[#allocation2 + $0xe0] sm:$0xff]  ;;  %266 = vmatpush.msra.mxu3 %v133_v10  ;;  %247 = vmatpush.msra.mxu2 %v116_v11  ;;  %v99_v19 = vld [vmem:[#allocation2 + $0xd8] sm:$0xff]  ;;  %v130_v22 = vld [vmem:[#allocation2 + $0x1d0] sm:$0xff] }
  0x14   :  { %226 = vmatpush.msra.mxu1 %v101_v13  ;;  %207 = vmatpush.msra.mxu0 %v84_v12  ;;  %v98_v23 = vld [vmem:[#allocation2 + $0xd0] sm:$0xff]  ;;  %v113_v24 = vld [vmem:[#allocation2 + $0x148] sm:$0xff]  ;;  %v112_v28 = vld [vmem:[#allocation2 + $0x140] sm:$0xff] }
  0x15   :  { %267 = vmatpush.msra.mxu3 %v132_v14  ;;  %248 = vmatpush.msra.mxu2 %v115_v16  ;;  %v81_v25 = vld [vmem:[#allocation2 + $0x48] sm:$0xff]  ;;  %v80_v29 = vld [vmem:[#allocation2 + $0x40] sm:$0xff]  ;;  %v111_v32 = vld [vmem:[#allocation2 + $0x138] sm:$0xff] }
  0x16   :  { %227 = vmatpush.msra.mxu1 %v100_v15  ;;  %208 = vmatpush.msra.mxu0 %v83_v17  ;;  %v129_v26 = vld [vmem:[#allocation2 + $0x1c8] sm:$0xff]  ;;  %v128_v30 = vld [vmem:[#allocation2 + $0x1c0] sm:$0xff]  ;;  %v79_v33 = vld [vmem:[#allocation2 + $0x38] sm:$0xff] }
  0x17   :  { %268 = vmatpush.msra.mxu3 %v131_v18  ;;  %249 = vmatpush.msra.mxu2 %v114_v20  ;;  %v97_v27 = vld [vmem:[#allocation2 + $0xc8] sm:$0xff]  ;;  %v96_v31 = vld [vmem:[#allocation2 + $0xc0] sm:$0xff]  ;;  %v127_v34 = vld [vmem:[#allocation2 + $0x1b8] sm:$0xff] }
  0x18   :  { %228 = vmatpush.msra.mxu1 %v99_v19  ;;  %209 = vmatpush.msra.mxu0 %v82_v21  ;;  %v95_v35 = vld [vmem:[#allocation2 + $0xb8] sm:$0xff]  ;;  %v110_v36 = vld [vmem:[#allocation2 + $0x130] sm:$0xff]  ;;  %v109_v40 = vld [vmem:[#allocation2 + $0x128] sm:$0xff] }
  0x19   :  { %269 = vmatpush.msra.mxu3 %v130_v22  ;;  %250 = vmatpush.msra.mxu2 %v113_v24  ;;  %v78_v37 = vld [vmem:[#allocation2 + $0x30] sm:$0xff]  ;;  %v77_v41 = vld [vmem:[#allocation2 + $0x28] sm:$0xff]  ;;  %v108_v44 = vld [vmem:[#allocation2 + $0x120] sm:$0xff] }
  0x1a   :  { %229 = vmatpush.msra.mxu1 %v98_v23  ;;  %210 = vmatpush.msra.mxu0 %v81_v25  ;;  %v126_v38 = vld [vmem:[#allocation2 + $0x1b0] sm:$0xff]  ;;  %v125_v42 = vld [vmem:[#allocation2 + $0x1a8] sm:$0xff]  ;;  %v76_v45 = vld [vmem:[#allocation2 + $0x20] sm:$0xff] }
  0x1b   :  { %270 = vmatpush.msra.mxu3 %v129_v26  ;;  %251 = vmatpush.msra.mxu2 %v112_v28  ;;  %v94_v39 = vld [vmem:[#allocation2 + $0xb0] sm:$0xff]  ;;  %v93_v43 = vld [vmem:[#allocation2 + $0xa8] sm:$0xff]  ;;  %v124_v46 = vld [vmem:[#allocation2 + $0x1a0] sm:$0xff] }
  0x1c   :  { %230 = vmatpush.msra.mxu1 %v97_v27  ;;  %211 = vmatpush.msra.mxu0 %v80_v29  ;;  %v92_v47 = vld [vmem:[#allocation2 + $0xa0] sm:$0xff]  ;;  %v107_v48 = vld [vmem:[#allocation2 + $0x118] sm:$0xff]  ;;  %v106_v52 = vld [vmem:[#allocation2 + $0x110] sm:$0xff] }
  0x1d   :  { %271 = vmatpush.msra.mxu3 %v128_v30  ;;  %252 = vmatpush.msra.mxu2 %v111_v32  ;;  %v75_v49 = vld [vmem:[#allocation2 + $0x18] sm:$0xff]  ;;  %v74_v53 = vld [vmem:[#allocation2 + $0x10] sm:$0xff]  ;;  %v105_v56 = vld [vmem:[#allocation2 + $0x108] sm:$0xff] }
  0x1e   :  { %231 = vmatpush.msra.mxu1 %v96_v31  ;;  %212 = vmatpush.msra.mxu0 %v79_v33  ;;  %v123_v50 = vld [vmem:[#allocation2 + $0x198] sm:$0xff]  ;;  %v122_v54 = vld [vmem:[#allocation2 + $0x190] sm:$0xff]  ;;  %v73_v57 = vld [vmem:[#allocation2 + $0x8] sm:$0xff] }
  0x1f   :  { %272 = vmatpush.msra.mxu3 %v127_v34  ;;  %253 = vmatpush.msra.mxu2 %v110_v36  ;;  %v91_v51 = vld [vmem:[#allocation2 + $0x98] sm:$0xff]  ;;  %v90_v55 = vld [vmem:[#allocation2 + $0x90] sm:$0xff]  ;;  %v121_v58 = vld [vmem:[#allocation2 + $0x188] sm:$0xff] }
  0x20   :  { %232 = vmatpush.msra.mxu1 %v95_v35  ;;  %213 = vmatpush.msra.mxu0 %v78_v37  ;;  %v89_v59 = vld [vmem:[#allocation2 + $0x88] sm:$0xff]  ;;  %v104_v60 = vld [vmem:[#allocation2 + $0x100] sm:$0xff]  ;;  %v183_v62 = vld [vmem:[#allocation2 + $0x378] sm:$0xff] }
  0x21   :  { %273 = vmatpush.msra.mxu3 %v126_v38  ;;  %254 = vmatpush.msra.mxu2 %v109_v40  ;;  %v72_v61 = vld [vmem:[#allocation2] sm:$0xff]  ;;  %v151_v0 = vld [vmem:[#allocation2 + $0x278] sm:$0xff]  ;;  %v182_v2 = vld [vmem:[#allocation2 + $0x370] sm:$0xff] }
  0x22   :  { %233 = vmatpush.msra.mxu1 %v94_v39  ;;  %214 = vmatpush.msra.mxu0 %v77_v41  ;;  %v120_v63 = vld [vmem:[#allocation2 + $0x180] sm:$0xff]  ;;  %v199_v1 = vld [vmem:[#allocation2 + $0x3f8] sm:$0xff]  ;;  %v150_v4 = vld [vmem:[#allocation2 + $0x270] sm:$0xff] }
  0x23   :  { %274 = vmatpush.msra.mxu3 %v125_v42  ;;  %255 = vmatpush.msra.mxu2 %v108_v44  ;;  %v88_v3 = vld [vmem:[#allocation2 + $0x80] sm:$0xff]  ;;  %v167_v5 = vld [vmem:[#allocation2 + $0x2f8] sm:$0xff]  ;;  %v181_v6 = vld [vmem:[#allocation2 + $0x368] sm:$0xff] }
  0x24   :  { %234 = vmatpush.msra.mxu1 %v93_v43  ;;  %215 = vmatpush.msra.mxu0 %v76_v45  ;;  %v198_v7 = vld [vmem:[#allocation2 + $0x3f0] sm:$0xff]  ;;  %v149_v8 = vld [vmem:[#allocation2 + $0x268] sm:$0xff]  ;;  %v180_v10 = vld [vmem:[#allocation2 + $0x360] sm:$0xff] }
  0x25   :  { %275 = vmatpush.msra.mxu3 %v124_v46  ;;  %256 = vmatpush.msra.mxu2 %v107_v48  ;;  %v166_v9 = vld [vmem:[#allocation2 + $0x2f0] sm:$0xff]  ;;  %v197_v11 = vld [vmem:[#allocation2 + $0x3e8] sm:$0xff]  ;;  %v148_v12 = vld [vmem:[#allocation2 + $0x260] sm:$0xff] }
  0x26   :  { %235 = vmatpush.msra.mxu1 %v92_v47  ;;  %216 = vmatpush.msra.mxu0 %v75_v49  ;;  %v165_v13 = vld [vmem:[#allocation2 + $0x2e8] sm:$0xff]  ;;  %v179_v14 = vld [vmem:[#allocation2 + $0x358] sm:$0xff]  ;;  %v196_v15 = vld [vmem:[#allocation2 + $0x3e0] sm:$0xff] }
  0x27   :  { %276 = vmatpush.msra.mxu3 %v123_v50  ;;  %257 = vmatpush.msra.mxu2 %v106_v52  ;;  %v147_v16 = vld [vmem:[#allocation2 + $0x258] sm:$0xff]  ;;  %v164_v17 = vld [vmem:[#allocation2 + $0x2e0] sm:$0xff]  ;;  %v178_v18 = vld [vmem:[#allocation2 + $0x350] sm:$0xff] }
  0x28   :  { %236 = vmatpush.msra.mxu1 %v91_v51  ;;  %217 = vmatpush.msra.mxu0 %v74_v53  ;;  %v195_v19 = vld [vmem:[#allocation2 + $0x3d8] sm:$0xff]  ;;  %v146_v20 = vld [vmem:[#allocation2 + $0x250] sm:$0xff]  ;;  %v177_v22 = vld [vmem:[#allocation2 + $0x348] sm:$0xff] }
  0x29   :  { %277 = vmatpush.msra.mxu3 %v122_v54  ;;  %258 = vmatpush.msra.mxu2 %v105_v56  ;;  %v163_v21 = vld [vmem:[#allocation2 + $0x2d8] sm:$0xff]  ;;  %v194_v23 = vld [vmem:[#allocation2 + $0x3d0] sm:$0xff]  ;;  %v145_v24 = vld [vmem:[#allocation2 + $0x248] sm:$0xff] }
  0x2a   :  { %237 = vmatpush.msra.mxu1 %v90_v55  ;;  %218 = vmatpush.msra.mxu0 %v73_v57  ;;  %v162_v25 = vld [vmem:[#allocation2 + $0x2d0] sm:$0xff]  ;;  %v176_v26 = vld [vmem:[#allocation2 + $0x340] sm:$0xff]  ;;  %v193_v27 = vld [vmem:[#allocation2 + $0x3c8] sm:$0xff] }
  0x2b   :  { %278 = vmatpush.msra.mxu3 %v121_v58  ;;  %259 = vmatpush.msra.mxu2 %v104_v60  ;;  %v144_v28 = vld [vmem:[#allocation2 + $0x240] sm:$0xff]  ;;  %v161_v29 = vld [vmem:[#allocation2 + $0x2c8] sm:$0xff]  ;;  %v175_v30 = vld [vmem:[#allocation2 + $0x338] sm:$0xff] }
  0x2c   :  { %238 = vmatpush.msra.mxu1 %v89_v59  ;;  %219 = vmatpush.msra.mxu0 %v72_v61  ;;  %v192_v31 = vld [vmem:[#allocation2 + $0x3c0] sm:$0xff]  ;;  %v143_v32 = vld [vmem:[#allocation2 + $0x238] sm:$0xff]  ;;  %v174_v34 = vld [vmem:[#allocation2 + $0x330] sm:$0xff] }
  0x2d   :  { %324 = vmatpush.msrb.mxu2 %v183_v62  ;;  %279 = vmatpush.msra.mxu3 %v120_v63  ;;  %v160_v33 = vld [vmem:[#allocation2 + $0x2c0] sm:$0xff]  ;;  %v191_v35 = vld [vmem:[#allocation2 + $0x3b8] sm:$0xff]  ;;  %v142_v36 = vld [vmem:[#allocation2 + $0x230] sm:$0xff] }
  0x2e   :  { %284 = vmatpush.msrb.mxu0 %v151_v0  ;;  %239 = vmatpush.msra.mxu1 %v88_v3  ;;  %v159_v37 = vld [vmem:[#allocation2 + $0x2b8] sm:$0xff]  ;;  %v173_v38 = vld [vmem:[#allocation2 + $0x328] sm:$0xff]  ;;  %v190_v39 = vld [vmem:[#allocation2 + $0x3b0] sm:$0xff] }
  0x2f   :  { %344 = vmatpush.msrb.mxu3 %v199_v1  ;;  %325 = vmatpush.msrb.mxu2 %v182_v2  ;;  %v141_v40 = vld [vmem:[#allocation2 + $0x228] sm:$0xff]  ;;  %v158_v41 = vld [vmem:[#allocation2 + $0x2b0] sm:$0xff]  ;;  %v172_v42 = vld [vmem:[#allocation2 + $0x320] sm:$0xff] }
  0x30   :  { %285 = vmatpush.msrb.mxu0 %v150_v4  ;;  %304 = vmatpush.msrb.mxu1 %v167_v5  ;;  %v189_v43 = vld [vmem:[#allocation2 + $0x3a8] sm:$0xff]  ;;  %v916_v44 = vld [vmem:[%s1044_s0 + $0x10] sm:$0xff]  ;;  %v140_v45 = vld [vmem:[#allocation2 + $0x220] sm:$0xff] }
  0x31   :  { %326 = vmatpush.msrb.mxu2 %v181_v6  ;;  %345 = vmatpush.msrb.mxu3 %v198_v7  ;;  %v157_v46 = vld [vmem:[#allocation2 + $0x2a8] sm:$0xff]  ;;  %v171_v47 = vld [vmem:[#allocation2 + $0x318] sm:$0xff]  ;;  %v188_v48 = vld [vmem:[#allocation2 + $0x3a0] sm:$0xff] }
  0x32   :  { %286 = vmatpush.msrb.mxu0 %v149_v8  ;;  %305 = vmatpush.msrb.mxu1 %v166_v9  ;;  %v921_v49 = vld [vmem:[%s1044_s0] sm:$0xff]  ;;  %v927_v50 = vld [vmem:[%s1044_s0 + $0x18] sm:$0xff]  ;;  %v170_v53 = vld [vmem:[#allocation2 + $0x310] sm:$0xff] }
  0x33   :  { %327 = vmatpush.msrb.mxu2 %v180_v10  ;;  %346 = vmatpush.msrb.mxu3 %v197_v11  ;;  %v139_v51 = vld [vmem:[#allocation2 + $0x218] sm:$0xff]  ;;  %v156_v52 = vld [vmem:[#allocation2 + $0x2a0] sm:$0xff]  ;;  %v933_v55 = vld [vmem:[%s1044_s0 + $0x8] sm:$0xff] }
  0x34   :  { %287 = vmatpush.msrb.mxu0 %v148_v12  ;;  %306 = vmatpush.msrb.mxu1 %v165_v13  ;;  %v187_v54 = vld [vmem:[#allocation2 + $0x398] sm:$0xff]  ;;  %v138_v56 = vld [vmem:[#allocation2 + $0x210] sm:$0xff]  ;;  %v169_v58 = vld [vmem:[#allocation2 + $0x308] sm:$0xff] }
  0x35   :  { %328 = vmatpush.msrb.mxu2 %v179_v14  ;;  %347 = vmatpush.msrb.mxu3 %v196_v15  ;;  %v155_v57 = vld [vmem:[#allocation2 + $0x298] sm:$0xff]  ;;  %v186_v59 = vld [vmem:[#allocation2 + $0x390] sm:$0xff]  ;;  %v137_v60 = vld [vmem:[#allocation2 + $0x208] sm:$0xff] }
  0x36   :  { %288 = vmatpush.msrb.mxu0 %v147_v16  ;;  %307 = vmatpush.msrb.mxu1 %v164_v17  ;;  %v154_v61 = vld [vmem:[#allocation2 + $0x290] sm:$0xff]  ;;  %v168_v62 = vld [vmem:[#allocation2 + $0x300] sm:$0xff]  ;;  %v185_v63 = vld [vmem:[#allocation2 + $0x388] sm:$0xff] }
  0x37   :  { %329 = vmatpush.msrb.mxu2 %v178_v18  ;;  %348 = vmatpush.msrb.mxu3 %v195_v19  ;;  %v940_v0 = vld [vmem:[%s1044_s0 + $0x30] sm:$0xff]  ;;  %v136_v1 = vld [vmem:[#allocation2 + $0x200] sm:$0xff]  ;;  %v153_v2 = vld [vmem:[#allocation2 + $0x288] sm:$0xff] }
  0x38   :  { %289 = vmatpush.msrb.mxu0 %v146_v20  ;;  %308 = vmatpush.msrb.mxu1 %v163_v21  ;;  %v184_v3 = vld [vmem:[#allocation2 + $0x380] sm:$0xff]  ;;  %v950_v5 = vld [vmem:[%s1044_s0 + $0x38] sm:$0xff]  ;;  %v959_v8 = vld [vmem:[%s1044_s0 + $0x28] sm:$0xff] }
  0x39   :  { %330 = vmatpush.msrb.mxu2 %v177_v22  ;;  %349 = vmatpush.msrb.mxu3 %v194_v23  ;;  %v945_v4 = vld [vmem:[%s1044_s0 + $0x20] sm:$0xff]  ;;  %v380_v7 = vld [vmem:[%s1047_s3 + $0x78] sm:$0xff]  ;;  %v379_v9 = vld [vmem:[%s1047_s3 + $0x70] sm:$0xff] }
  0x3a   :  { %290 = vmatpush.msrb.mxu0 %v145_v24  ;;  %309 = vmatpush.msrb.mxu1 %v162_v25  ;;  %v152_v6 = vld [vmem:[#allocation2 + $0x280] sm:$0xff]  ;;  %v378_v10 = vld [vmem:[%s1047_s3 + $0x68] sm:$0xff]  ;;  %v376_v12 = vld [vmem:[%s1047_s3 + $0x58] sm:$0xff] }
  0x3b   :  { %331 = vmatpush.msrb.mxu2 %v176_v26  ;;  %350 = vmatpush.msrb.mxu3 %v193_v27  ;;  %v377_v11 = vld [vmem:[%s1047_s3 + $0x60] sm:$0xff]  ;;  %v375_v13 = vld [vmem:[%s1047_s3 + $0x50] sm:$0xff]  ;;  %v374_v14 = vld [vmem:[%s1047_s3 + $0x48] sm:$0xff] }
  0x3c   :  { %291 = vmatpush.msrb.mxu0 %v144_v28  ;;  %310 = vmatpush.msrb.mxu1 %v161_v29  ;;  %v373_v15 = vld [vmem:[%s1047_s3 + $0x40] sm:$0xff]  ;;  %v372_v16 = vld [vmem:[%s1047_s3 + $0x38] sm:$0xff]  ;;  %v371_v17 = vld [vmem:[%s1047_s3 + $0x30] sm:$0xff] }
  0x3d   :  { %332 = vmatpush.msrb.mxu2 %v175_v30  ;;  %351 = vmatpush.msrb.mxu3 %v192_v31  ;;  %v370_v18 = vld [vmem:[%s1047_s3 + $0x28] sm:$0xff]  ;;  %v369_v19 = vld [vmem:[%s1047_s3 + $0x20] sm:$0xff]  ;;  %v368_v20 = vld [vmem:[%s1047_s3 + $0x18] sm:$0xff] }
  0x3e   :  { %292 = vmatpush.msrb.mxu0 %v143_v32  ;;  %311 = vmatpush.msrb.mxu1 %v160_v33  ;;  %v367_v21 = vld [vmem:[%s1047_s3 + $0x10] sm:$0xff]  ;;  %v366_v22 = vld [vmem:[%s1047_s3 + $0x8] sm:$0xff]  ;;  %v365_v23 = vld [vmem:[%s1047_s3] sm:$0xff] }
  0x3f   :  { %333 = vmatpush.msrb.mxu2 %v174_v34  ;;  %352 = vmatpush.msrb.mxu3 %v191_v35  ;;  %v408_v24 = vld [vmem:[%s1049_s5 + $0x18] sm:$0xff]  ;;  %v407_v25 = vld [vmem:[%s1049_s5 + $0x10] sm:$0xff]  ;;  %v406_v26 = vld [vmem:[%s1049_s5 + $0x8] sm:$0xff] }
  0x40   :  { %293 = vmatpush.msrb.mxu0 %v142_v36  ;;  %312 = vmatpush.msrb.mxu1 %v159_v37  ;;  %v793_v27 = vld [vmem:[%s1046_s2] ss:$0 sm:$0xff] }
  0x41   :  { %334 = vmatpush.msrb.mxu2 %v173_v38  ;;  %353 = vmatpush.msrb.mxu3 %v190_v39 }
  0x42   :  { %294 = vmatpush.msrb.mxu0 %v141_v40  ;;  %313 = vmatpush.msrb.mxu1 %v158_v41 }
  0x43   :  { %335 = vmatpush.msrb.mxu2 %v172_v42  ;;  %354 = vmatpush.msrb.mxu3 %v189_v43 }
  0x44   :  { %260 = vmatmul.f32.vlgmr.msra.gmra.mxu2 %v916_v44  ;;  %295 = vmatpush.msrb.mxu0 %v140_v45 }
  0x45   :  { %314 = vmatpush.msrb.mxu1 %v157_v46  ;;  %336 = vmatpush.msrb.mxu2 %v171_v47  ;;  %v405_v46 = vld [vmem:[%s1049_s5] sm:$0xff] }
  0x46   :  { %355 = vmatpush.msrb.mxu3 %v188_v48  ;;  %220 = vmatmul.f32.vlgmr.msra.gmra.mxu0 %v921_v49  ;;  %v558_v47 = vld [vmem:[#allocation4 + $0x3c0] sm:$0xff]  ;;  %v559_v48 = vld [vmem:[#allocation4 + $0x3c8] sm:$0xff] }
  0x47   :  { %280 = vmatmul.f32.vlgmr.msra.gmra.mxu3 %v927_v50  ;;  %296 = vmatpush.msrb.mxu0 %v139_v51  ;;  %v560_v51 = vld [vmem:[#allocation4 + $0x3d0] sm:$0xff] }
  0x48   :  { %315 = vmatpush.msrb.mxu1 %v156_v52  ;;  %337 = vmatpush.msrb.mxu2 %v170_v53  ;;  %v561_v52 = vld [vmem:[#allocation4 + $0x3d8] sm:$0xff]  ;;  %v550_v53 = vld [vmem:[#allocation4 + $0x380] sm:$0xff] }
  0x49   :  { %356 = vmatpush.msrb.mxu3 %v187_v54  ;;  %240 = vmatmul.f32.vlgmr.msra.gmra.mxu1 %v933_v55  ;;  %v551_v54 = vld [vmem:[#allocation4 + $0x388] sm:$0xff] }
  0x4a   :  { %297 = vmatpush.msrb.mxu0 %v138_v56  ;;  %316 = vmatpush.msrb.mxu1 %v155_v57  ;;  %v552_v56 = vld [vmem:[#allocation4 + $0x390] sm:$0xff]  ;;  %v553_v57 = vld [vmem:[#allocation4 + $0x398] sm:$0xff] }
  0x4b   :  { %338 = vmatpush.msrb.mxu2 %v169_v58  ;;  %357 = vmatpush.msrb.mxu3 %v186_v59  ;;  %v542_v58 = vld [vmem:[#allocation4 + $0x340] sm:$0xff]  ;;  %v543_v59 = vld [vmem:[#allocation4 + $0x348] sm:$0xff] }
  0x4c   :  { %298 = vmatpush.msrb.mxu0 %v137_v60  ;;  %317 = vmatpush.msrb.mxu1 %v154_v61  ;;  %v544_v60 = vld [vmem:[#allocation4 + $0x350] sm:$0xff]  ;;  %v545_v61 = vld [vmem:[#allocation4 + $0x358] sm:$0xff] }
  0x4d   :  { %339 = vmatpush.msrb.mxu2 %v168_v62  ;;  %358 = vmatpush.msrb.mxu3 %v185_v63  ;;  %v534_v62 = vld [vmem:[#allocation4 + $0x300] sm:$0xff]  ;;  %v535_v63 = vld [vmem:[#allocation4 + $0x308] sm:$0xff] }
  0x4e   :  { %340 = vmatmul.f32.vlgmr.msrb.gmra.mxu2 %v940_v0  ;;  %299 = vmatpush.msrb.mxu0 %v136_v1  ;;  %v536_v1 = vld [vmem:[#allocation4 + $0x310] sm:$0xff] }
  0x4f   :  { %318 = vmatpush.msrb.mxu1 %v153_v2  ;;  %359 = vmatpush.msrb.mxu3 %v184_v3  ;;  %v537_v2 = vld [vmem:[#allocation4 + $0x318] sm:$0xff]  ;;  %v526_v3 = vld [vmem:[#allocation4 + $0x2c0] sm:$0xff] }
  0x50   :  { %300 = vmatmul.f32.vlgmr.msrb.gmra.mxu0 %v945_v4  ;;  %360 = vmatmul.f32.vlgmr.msrb.gmra.mxu3 %v950_v5 }
  0x51   :  { %319 = vmatpush.msrb.mxu1 %v152_v6  ;;  %385 = vmatpush.msra.mxu0 %v380_v7  ;;  %v527_v6 = vld [vmem:[#allocation4 + $0x2c8] sm:$0xff]  ;;  %v528_v7 = vld [vmem:[#allocation4 + $0x2d0] sm:$0xff] }
  0x52   :  { %320 = vmatmul.f32.vlgmr.msrb.gmra.mxu1 %v959_v8  ;;  %584 = vmatpush.msra.mxu2 %v558_v47  ;;  %v794_v47 = vld [vmem:[%s1048_s4] ss:$0 sm:$0xff] }
  0x53   :  { %386 = vmatpush.msra.mxu0 %v379_v9  ;;  %429 = vmatpush.msra.mxu1 %v408_v24  ;;  %v529_v9 = vld [vmem:[#allocation4 + $0x2d8] sm:$0xff]  ;;  %v496_v24 = vld [vmem:[#allocation4 + $0x1d0] sm:$0xff] }
  0x54   :  { %604 = vmatpush.msra.mxu3 %v559_v48  ;;  %585 = vmatpush.msra.mxu2 %v550_v53  ;;  %v446_v48 = vld [vmem:[#allocation4 + $0x40] sm:$0xff]  ;;  %v449_v53 = vld [vmem:[#allocation4 + $0x58] sm:$0xff] }
  0x55   :  { %387 = vmatpush.msra.mxu0 %v378_v10  ;;  %430 = vmatpush.msra.mxu1 %v407_v25  ;;  %v518_v10 = vld [vmem:[#allocation4 + $0x280] sm:$0xff]  ;;  %v497_v25 = vld [vmem:[#allocation4 + $0x1d8] sm:$0xff] }
  0x56   :  { %605 = vmatpush.msra.mxu3 %v551_v54  ;;  %586 = vmatpush.msra.mxu2 %v542_v58  ;;  %v438_v54 = vld [vmem:[#allocation4] sm:$0xff]  ;;  %v441_v58 = vld [vmem:[#allocation4 + $0x18] sm:$0xff] }
  0x57   :  { %388 = vmatpush.msra.mxu0 %v377_v11  ;;  %431 = vmatpush.msra.mxu1 %v406_v26  ;;  %v519_v11 = vld [vmem:[#allocation4 + $0x288] sm:$0xff]  ;;  %v486_v26 = vld [vmem:[#allocation4 + $0x180] sm:$0xff] }
  0x58   :  { %606 = vmatpush.msra.mxu3 %v543_v59  ;;  %587 = vmatpush.msra.mxu2 %v534_v62  ;;  %v563_v62 = vld [vmem:[#allocation4 + $0x3e8] sm:$0xff] }
  0x59   :  { %389 = vmatpush.msra.mxu0 %v376_v12  ;;  %432 = vmatpush.msra.mxu1 %v405_v46  ;;  %v520_v12 = vld [vmem:[#allocation4 + $0x290] sm:$0xff]  ;;  %v457_v46 = vld [vmem:[#allocation4 + $0x98] sm:$0xff] }
  0x5a   :  { %607 = vmatpush.msra.mxu3 %v535_v63  ;;  %588 = vmatpush.msra.mxu2 %v526_v3  ;;  %v564_v63 = vld [vmem:[#allocation4 + $0x3f0] sm:$0xff]  ;;  %v555_v3 = vld [vmem:[#allocation4 + $0x3a8] sm:$0xff] }
  0x5b   :  { %390 = vmatpush.msra.mxu0 %v375_v13  ;;  %624 = vmatpush.msrb.mxu1 %v560_v51  ;;  %v521_v13 = vld [vmem:[#allocation4 + $0x298] sm:$0xff]  ;;  %v447_v51 = vld [vmem:[#allocation4 + $0x48] sm:$0xff] }
  0x5c   :  { %608 = vmatpush.msra.mxu3 %v527_v6  ;;  %589 = vmatpush.msra.mxu2 %v518_v10  ;;  %v556_v6 = vld [vmem:[#allocation4 + $0x3b0] sm:$0xff]  ;;  %v547_v10 = vld [vmem:[#allocation4 + $0x368] sm:$0xff] }
  0x5d   :  { %391 = vmatpush.msra.mxu0 %v374_v14  ;;  %625 = vmatpush.msrb.mxu1 %v552_v56  ;;  %v510_v14 = vld [vmem:[#allocation4 + $0x240] sm:$0xff]  ;;  %v439_v56 = vld [vmem:[#allocation4 + $0x8] sm:$0xff] }
  0x5e   :  { %609 = vmatpush.msra.mxu3 %v519_v11  ;;  %590 = vmatpush.msra.mxu2 %v510_v14  ;;  %v548_v11 = vld [vmem:[#allocation4 + $0x370] sm:$0xff]  ;;  %v539_v14 = vld [vmem:[#allocation4 + $0x328] sm:$0xff] }
  0x5f   :  { %392 = vmatpush.msra.mxu0 %v373_v15  ;;  %626 = vmatpush.msrb.mxu1 %v544_v60  ;;  %v511_v15 = vld [vmem:[#allocation4 + $0x248] sm:$0xff]  ;;  %v440_v60 = vld [vmem:[#allocation4 + $0x10] sm:$0xff] }
  0x60   :  { %610 = vmatpush.msra.mxu3 %v511_v15  ;;  %v540_v15 = vld [vmem:[#allocation4 + $0x330] sm:$0xff] }
  0x61   :  { %393 = vmatpush.msra.mxu0 %v372_v16  ;;  %627 = vmatpush.msrb.mxu1 %v536_v1  ;;  %v512_v16 = vld [vmem:[#allocation4 + $0x250] sm:$0xff]  ;;  %v565_v1 = vld [vmem:[#allocation4 + $0x3f8] sm:$0xff] }
  0x63   :  { %394 = vmatpush.msra.mxu0 %v371_v17  ;;  %628 = vmatpush.msrb.mxu1 %v528_v7  ;;  %v513_v17 = vld [vmem:[#allocation4 + $0x258] sm:$0xff] }
  0x64   :  { %v557_v7 = vld [vmem:[#allocation4 + $0x3b8] sm:$0xff] }
  0x65   :  { %395 = vmatpush.msra.mxu0 %v370_v18  ;;  %629 = vmatpush.msrb.mxu1 %v520_v12  ;;  %v502_v18 = vld [vmem:[#allocation4 + $0x200] sm:$0xff]  ;;  %v549_v12 = vld [vmem:[#allocation4 + $0x378] sm:$0xff] }
  0x66   :  { %591 = vmatpush.msra.mxu2 %v502_v18  ;;  %v531_v18 = vld [vmem:[#allocation4 + $0x2e8] sm:$0xff] }
  0x67   :  { %396 = vmatpush.msra.mxu0 %v369_v19  ;;  %v503_v19 = vld [vmem:[#allocation4 + $0x208] sm:$0xff]  ;;  %630 = vmatpush.msrb.mxu1 %v512_v16  ;;  %v541_v16 = vld [vmem:[#allocation4 + $0x338] sm:$0xff] }
  0x68   :  { %611 = vmatpush.msra.mxu3 %v503_v19  ;;  %v532_v19 = vld [vmem:[#allocation4 + $0x2f0] sm:$0xff] }
  0x69   :  { %397 = vmatpush.msra.mxu0 %v368_v20  ;;  %v504_v20 = vld [vmem:[#allocation4 + $0x210] sm:$0xff] }
  0x6a   :  { %631 = vmatpush.msrb.mxu1 %v504_v20  ;;  %v533_v20 = vld [vmem:[#allocation4 + $0x2f8] sm:$0xff] }
  0x6b   :  { %398 = vmatpush.msra.mxu0 %v367_v21  ;;  %v505_v21 = vld [vmem:[#allocation4 + $0x218] sm:$0xff] }
  0x6c   :  { %632 = vmatpush.msrb.mxu1 %v496_v24  ;;  %v525_v24 = vld [vmem:[#allocation4 + $0x2b8] sm:$0xff] }
  0x6d   :  { %399 = vmatpush.msra.mxu0 %v366_v22  ;;  %v494_v22 = vld [vmem:[#allocation4 + $0x1c0] sm:$0xff] }
  0x6e   :  { %592 = vmatpush.msra.mxu2 %v494_v22  ;;  %v523_v22 = vld [vmem:[#allocation4 + $0x2a8] sm:$0xff] }
  0x6f   :  { %400 = vmatpush.msra.mxu0 %v365_v23  ;;  %v495_v23 = vld [vmem:[#allocation4 + $0x1c8] sm:$0xff] }
  0x70   :  { %612 = vmatpush.msra.mxu3 %v495_v23  ;;  %593 = vmatpush.msra.mxu2 %v486_v26  ;;  %v524_v23 = vld [vmem:[#allocation4 + $0x2b0] sm:$0xff]  ;;  %v515_v26 = vld [vmem:[#allocation4 + $0x268] sm:$0xff] }
  0x71   :  { %644 = vmatpush.msrb.mxu0 %v561_v52  ;;  %v448_v52 = vld [vmem:[#allocation4 + $0x50] sm:$0xff] }
  0x73   :  { %645 = vmatpush.msrb.mxu0 %v553_v57 }
  0x75   :  { %646 = vmatpush.msrb.mxu0 %v545_v61  ;;  %v562_v61 = vld [vmem:[#allocation4 + $0x3e0] sm:$0xff] }
  0x77   :  { %647 = vmatpush.msrb.mxu0 %v537_v2  ;;  %v554_v2 = vld [vmem:[#allocation4 + $0x3a0] sm:$0xff] }
  0x79   :  { %648 = vmatpush.msrb.mxu0 %v529_v9  ;;  %v546_v9 = vld [vmem:[#allocation4 + $0x360] sm:$0xff] }
  0x7b   :  { %649 = vmatpush.msrb.mxu0 %v521_v13  ;;  %v538_v13 = vld [vmem:[#allocation4 + $0x320] sm:$0xff] }
  0x7d   :  { %650 = vmatpush.msrb.mxu0 %v513_v17  ;;  %v530_v17 = vld [vmem:[#allocation4 + $0x2e0] sm:$0xff] }
  0x7f   :  { %651 = vmatpush.msrb.mxu0 %v505_v21  ;;  %v522_v21 = vld [vmem:[#allocation4 + $0x2a0] sm:$0xff] }
  0x81   :  { %652 = vmatpush.msrb.mxu0 %v497_v25  ;;  %v514_v25 = vld [vmem:[#allocation4 + $0x260] sm:$0xff] }
  0xc3   :  { %v221_v28 = vpop.f32.mrf.mxu0 }
  0xc4   :  { %v222_v29 = vadd.f32 %v793_v27, %v221_v28  ;;  %v487_v27 = vld [vmem:[#allocation4 + $0x188] sm:$0xff]  ;;  %v488_v28 = vld [vmem:[#allocation4 + $0x190] sm:$0xff] }
  0xc5   :  { %613 = vmatpush.msra.mxu3 %v487_v27  ;;  %633 = vmatpush.msrb.mxu1 %v488_v28  ;;  %v516_v27 = vld [vmem:[#allocation4 + $0x270] sm:$0xff]  ;;  %v517_v28 = vld [vmem:[#allocation4 + $0x278] sm:$0xff] }
  0xc6   :  { %v241_v30 = vpop.f32.mrf.mxu1 }
  0xc7   :  { %v242_v31 = vadd.f32 %v241_v30, %v222_v29  ;;  %v261_v32 = vpop.f32.mrf.mxu2  ;;  %v489_v29 = vld [vmem:[#allocation4 + $0x198] sm:$0xff]  ;;  %v478_v30 = vld [vmem:[#allocation4 + $0x140] sm:$0xff] }
  0xc8   :  { %653 = vmatpush.msrb.mxu0 %v489_v29  ;;  %594 = vmatpush.msra.mxu2 %v478_v30  ;;  %v506_v29 = vld [vmem:[#allocation4 + $0x220] sm:$0xff]  ;;  %v507_v30 = vld [vmem:[#allocation4 + $0x228] sm:$0xff] }
  0xc9   :  { %v262_v33 = vadd.f32 %v261_v32, %v242_v31  ;;  %v479_v31 = vld [vmem:[#allocation4 + $0x148] sm:$0xff]  ;;  %v480_v32 = vld [vmem:[#allocation4 + $0x150] sm:$0xff] }
  0xca   :  { %v281_v34 = vpop.f32.mrf.mxu3  ;;  %614 = vmatpush.msra.mxu3 %v479_v31  ;;  %634 = vmatpush.msrb.mxu1 %v480_v32  ;;  %v508_v31 = vld [vmem:[#allocation4 + $0x230] sm:$0xff]  ;;  %v509_v32 = vld [vmem:[#allocation4 + $0x238] sm:$0xff] }
  0xcb   :  { %v282_v35 = vadd.f32 %v281_v34, %v262_v33  ;;  %v481_v33 = vld [vmem:[#allocation4 + $0x158] sm:$0xff]  ;;  %v470_v34 = vld [vmem:[#allocation4 + $0x100] sm:$0xff] }
  0xcc   :  { %654 = vmatpush.msrb.mxu0 %v481_v33  ;;  %595 = vmatpush.msra.mxu2 %v470_v34  ;;  %v498_v33 = vld [vmem:[#allocation4 + $0x1e0] sm:$0xff]  ;;  %v499_v34 = vld [vmem:[#allocation4 + $0x1e8] sm:$0xff] }
  0xcd   :  { %v301_v36 = vpop.f32.mrf.mxu0 }
  0xce   :  { %v302_v37 = vadd.f32 %v301_v36, %v282_v35  ;;  %v471_v35 = vld [vmem:[#allocation4 + $0x108] sm:$0xff]  ;;  %v472_v36 = vld [vmem:[#allocation4 + $0x110] sm:$0xff] }
  0xcf   :  { %v321_v38 = vpop.f32.mrf.mxu1  ;;  %615 = vmatpush.msra.mxu3 %v471_v35  ;;  %635 = vmatpush.msrb.mxu1 %v472_v36  ;;  %v500_v35 = vld [vmem:[#allocation4 + $0x1f0] sm:$0xff]  ;;  %v501_v36 = vld [vmem:[#allocation4 + $0x1f8] sm:$0xff] }
  0xd0   :  { %v322_v39 = vadd.f32 %v321_v38, %v302_v37  ;;  %v473_v37 = vld [vmem:[#allocation4 + $0x118] sm:$0xff]  ;;  %v462_v38 = vld [vmem:[#allocation4 + $0xc0] sm:$0xff] }
  0xd1   :  { %v341_v40 = vpop.f32.mrf.mxu2  ;;  %655 = vmatpush.msrb.mxu0 %v473_v37  ;;  %596 = vmatpush.msra.mxu2 %v462_v38  ;;  %v490_v37 = vld [vmem:[#allocation4 + $0x1a0] sm:$0xff]  ;;  %v491_v38 = vld [vmem:[#allocation4 + $0x1a8] sm:$0xff] }
  0xd2   :  { %v342_v41 = vadd.f32 %v341_v40, %v322_v39  ;;  %v463_v39 = vld [vmem:[#allocation4 + $0xc8] sm:$0xff]  ;;  %v464_v40 = vld [vmem:[#allocation4 + $0xd0] sm:$0xff] }
  0xd3   :  { %v361_v42 = vpop.f32.mrf.mxu3  ;;  %616 = vmatpush.msra.mxu3 %v463_v39  ;;  %636 = vmatpush.msrb.mxu1 %v464_v40  ;;  %v492_v39 = vld [vmem:[#allocation4 + $0x1b0] sm:$0xff]  ;;  %v493_v40 = vld [vmem:[#allocation4 + $0x1b8] sm:$0xff] }
  0xd4   :  { %v362_v43 = vadd.f32 %v361_v42, %v342_v41  ;;  %v465_v41 = vld [vmem:[#allocation4 + $0xd8] sm:$0xff]  ;;  %v454_v42 = vld [vmem:[#allocation4 + $0x80] sm:$0xff] }
  0xd5   :  { %656 = vmatpush.msrb.mxu0 %v465_v41  ;;  %597 = vmatpush.msra.mxu2 %v454_v42  ;;  %v482_v41 = vld [vmem:[#allocation4 + $0x160] sm:$0xff]  ;;  %v483_v42 = vld [vmem:[#allocation4 + $0x168] sm:$0xff] }
  0xd6   :  { %v364_v45 = vmax.f32 %v362_v43, 0.0  ;;  %v455_v43 = vld [vmem:[#allocation4 + $0x88] sm:$0xff] }
  0xd7   :  { %617 = vmatpush.msra.mxu3 %v455_v43  ;;  %657 = vmatpush.msrb.mxu0 %v457_v46  ;;  %v484_v43 = vld [vmem:[#allocation4 + $0x170] sm:$0xff]  ;;  %v474_v46 = vld [vmem:[#allocation4 + $0x120] sm:$0xff] }
  0xd8   :  { %401 = vmatmul.f32.vlgmr.msra.gmra.mxu0 %v364_v45  ;;  %v456_v45 = vld [vmem:[#allocation4 + $0x90] sm:$0xff]  ;;  %598 = vmatpush.msra.mxu2 %v446_v48 }
  0xd9   :  { %637 = vmatpush.msrb.mxu1 %v456_v45  ;;  %618 = vmatpush.msra.mxu3 %v447_v51  ;;  %v485_v45 = vld [vmem:[#allocation4 + $0x178] sm:$0xff]  ;;  %v476_v48 = vld [vmem:[#allocation4 + $0x130] sm:$0xff] }
  0xda   :  { %658 = vmatpush.msrb.mxu0 %v449_v53  ;;  %599 = vmatpush.msra.mxu2 %v438_v54  ;;  %v477_v51 = vld [vmem:[#allocation4 + $0x138] sm:$0xff]  ;;  %v467_v53 = vld [vmem:[#allocation4 + $0xe8] sm:$0xff]  ;;  %v468_v54 = vld [vmem:[#allocation4 + $0xf0] sm:$0xff] }
  0xdb   :  { %638 = vmatpush.msrb.mxu1 %v448_v52  ;;  %619 = vmatpush.msra.mxu3 %v439_v56  ;;  %v466_v52 = vld [vmem:[#allocation4 + $0xe0] sm:$0xff]  ;;  %v469_v56 = vld [vmem:[#allocation4 + $0xf8] sm:$0xff] }
  0xdc   :  { %659 = vmatpush.msrb.mxu0 %v441_v58  ;;  %664 = vmatpush.msrb.mxu2 %v562_v61  ;;  %v459_v58 = vld [vmem:[#allocation4 + $0xa8] sm:$0xff]  ;;  %v450_v61 = vld [vmem:[#allocation4 + $0x60] sm:$0xff] }
  0xdd   :  { %639 = vmatpush.msrb.mxu1 %v440_v60  ;;  %684 = vmatpush.msrb.mxu3 %v563_v62  ;;  %v461_v60 = vld [vmem:[#allocation4 + $0xb8] sm:$0xff]  ;;  %v451_v62 = vld [vmem:[#allocation4 + $0x68] sm:$0xff] }
  0xde   :  { %724 = vmatpush.msra.mxu0 %v565_v1  ;;  %665 = vmatpush.msrb.mxu2 %v554_v2  ;;  %v453_v1 = vld [vmem:[#allocation4 + $0x78] sm:$0xff]  ;;  %v442_v2 = vld [vmem:[#allocation4 + $0x20] sm:$0xff] }
  0xdf   :  { %685 = vmatpush.msrb.mxu3 %v555_v3  ;;  %v443_v3 = vld [vmem:[#allocation4 + $0x28] sm:$0xff] }
  0xe0   :  { %725 = vmatpush.msra.mxu0 %v557_v7  ;;  %666 = vmatpush.msrb.mxu2 %v546_v9  ;;  %v445_v7 = vld [vmem:[#allocation4 + $0x38] sm:$0xff]  ;;  %v795_v9 = vld [vmem:[%s1050_s6] ss:$0 sm:$0xff] }
  0xe1   :  { %686 = vmatpush.msrb.mxu3 %v547_v10 }
  0xe2   :  { %726 = vmatpush.msra.mxu0 %v549_v12  ;;  %667 = vmatpush.msrb.mxu2 %v538_v13  ;;  %v566_v13 = vld [vmem:[%s1052_s8] sm:$0xff] }
  0xe3   :  { %687 = vmatpush.msrb.mxu3 %v539_v14  ;;  %v570_v14 = vperm.slane %v566_v13, 2 }
  0xe4   :  { %727 = vmatpush.msra.mxu0 %v541_v16  ;;  %668 = vmatpush.msrb.mxu2 %v530_v17  ;;  %v568_v17 = vperm.slane %v566_v13, 0 }
  0xe5   :  { %688 = vmatpush.msrb.mxu3 %v531_v18  ;;  %v569_v18 = vperm.slane %v566_v13, 1 }
  0xe6   :  { %728 = vmatpush.msra.mxu0 %v533_v20  ;;  %669 = vmatpush.msrb.mxu2 %v522_v21  ;;  %v571_v20 = vperm.slane %v566_v13, 3 }
  0xe7   :  { %689 = vmatpush.msrb.mxu3 %v523_v22 }
  0xe8   :  { %729 = vmatpush.msra.mxu0 %v525_v24  ;;  %670 = vmatpush.msrb.mxu2 %v514_v25 }
  0xe9   :  { %690 = vmatpush.msrb.mxu3 %v515_v26 }
  0xea   :  { %730 = vmatpush.msra.mxu0 %v517_v28  ;;  %671 = vmatpush.msrb.mxu2 %v506_v29  ;;  %v574_v29 = vperm.slane %v566_v13, 6 }
  0xeb   :  { %691 = vmatpush.msrb.mxu3 %v507_v30 }
  0xec   :  { %731 = vmatpush.msra.mxu0 %v509_v32  ;;  %672 = vmatpush.msrb.mxu2 %v498_v33  ;;  %v572_v32 = vperm.slane %v566_v13, 4  ;;  %v573_v33 = vperm.slane %v566_v13, 5 }
  0xed   :  { %692 = vmatpush.msrb.mxu3 %v499_v34 }
  0xee   :  { %732 = vmatpush.msra.mxu0 %v501_v36  ;;  %673 = vmatpush.msrb.mxu2 %v490_v37 }
  0xef   :  { %693 = vmatpush.msrb.mxu3 %v491_v38  ;;  %v575_v38 = vperm.slane %v566_v13, 7 }
  0xf0   :  { %733 = vmatpush.msra.mxu0 %v493_v40  ;;  %674 = vmatpush.msrb.mxu2 %v482_v41 }
  0xf1   :  { %694 = vmatpush.msrb.mxu3 %v483_v42 }
  0xf2   :  { %734 = vmatpush.msra.mxu0 %v485_v45  ;;  %675 = vmatpush.msrb.mxu2 %v474_v46 }
  0xf4   :  { %735 = vmatpush.msra.mxu0 %v477_v51  ;;  %676 = vmatpush.msrb.mxu2 %v466_v52 }
  0xf6   :  { %736 = vmatpush.msra.mxu0 %v469_v56 }
  0xf8   :  { %737 = vmatpush.msra.mxu0 %v461_v60 }
  0xfa   :  { %738 = vmatpush.msra.mxu0 %v453_v1 }
  0xfc   :  { %739 = vmatpush.msra.mxu0 %v445_v7 }
 0x155   :  { %v402_v57 = vpop.f32.mrf.mxu0 }
 0x156   :  { %v403_v59 = vadd.f32 %v794_v47, %v402_v57  ;;  %v475_v47 = vld [vmem:[#allocation4 + $0x128] sm:$0xff]  ;;  %v458_v57 = vld [vmem:[#allocation4 + $0xa0] sm:$0xff] }
 0x157   :  { %695 = vmatpush.msrb.mxu3 %v475_v47  ;;  %677 = vmatpush.msrb.mxu2 %v458_v57 }
 0x158   :  { %785 = vmatmul.msk.f32.vlgmr.msra.gmra.mxu1 %vm413_vm0, %v403_v59  ;;  %v460_v59 = vld [vmem:[#allocation4 + $0xb0] sm:$0xff] }
 0x159   :  { %704 = vmatpush.msra.mxu1 %v564_v63  ;;  %696 = vmatpush.msrb.mxu3 %v467_v53  ;;  %v452_v63 = vld [vmem:[#allocation4 + $0x70] sm:$0xff] }
 0x15a   :  { %678 = vmatpush.msrb.mxu2 %v450_v61  ;;  %v856_v61 = vmov 1024.0  }
 0x15b   :  { %705 = vmatpush.msra.mxu1 %v556_v6  ;;  %697 = vmatpush.msrb.mxu3 %v459_v58  ;;  %v444_v6 = vld [vmem:[#allocation4 + $0x30] sm:$0xff]  ;;  %796 = vrcp.f32 %v856_v61 }
 0x15c   :  { %679 = vmatpush.msrb.mxu2 %v442_v2 }
 0x15d   :  { %706 = vmatpush.msra.mxu1 %v548_v11  ;;  %698 = vmatpush.msrb.mxu3 %v451_v62 }
 0x15f   :  { %707 = vmatpush.msra.mxu1 %v540_v15  ;;  %699 = vmatpush.msrb.mxu3 %v443_v3 }
 0x161   :  { %708 = vmatpush.msra.mxu1 %v532_v19  ;;  %v797_v62 = vpop.eup %796 }
 0x162   :  { %vm774_vm1 = vweird.f32 %v797_v62 }
 0x163   :  { %709 = vmatpush.msra.mxu1 %v524_v23 }
 0x165   :  { %710 = vmatpush.msra.mxu1 %v516_v27 }
 0x167   :  { %711 = vmatpush.msra.mxu1 %v508_v31 }
 0x169   :  { %712 = vmatpush.msra.mxu1 %v500_v35 }
 0x16b   :  { %713 = vmatpush.msra.mxu1 %v492_v39 }
 0x16d   :  { %714 = vmatpush.msra.mxu1 %v484_v43 }
 0x16f   :  { %715 = vmatpush.msra.mxu1 %v476_v48 }
 0x171   :  { %716 = vmatpush.msra.mxu1 %v468_v54 }
 0x173   :  { %717 = vmatpush.msra.mxu1 %v460_v59 }
 0x175   :  { %718 = vmatpush.msra.mxu1 %v452_v63 }
 0x177   :  { %719 = vmatpush.msra.mxu1 %v444_v6 }
 0x1d5   :  { %v434_v10 = vpop.f32.mrf.mxu1 }
 0x1d6   :  { %v435_v11 = vadd.f32 %v795_v9, %v434_v10 }
 0x1d8   :  { %v437_v12 = vmax.f32 %v435_v11, 0.0 }
 0x1da   :  { %600 = vmatmul.f32.vlgmr.msra.gmra.mxu2 %v437_v12  ;;  %620 = vmatmul.f32.vlgmr.msra.gmra.mxu3 %v437_v12 }
 0x1db   :  { %640 = vmatmul.f32.vlgmr.msrb.gmra.mxu1 %v437_v12  ;;  %660 = vmatmul.f32.vlgmr.msrb.gmra.mxu0 %v437_v12 }
 0x1e2   :  { %680 = vmatmul.f32.vlgmr.msrb.gmra.mxu2 %v437_v12  ;;  %700 = vmatmul.f32.vlgmr.msrb.gmra.mxu3 %v437_v12 }
 0x1e3   :  { %720 = vmatmul.f32.vlgmr.msra.gmra.mxu1 %v437_v12  ;;  %740 = vmatmul.f32.vlgmr.msra.gmra.mxu0 %v437_v12 }
 0x258   :  { %v641_v15 = vpop.f32.mrf.mxu1  ;;  %v661_v16 = vpop.f32.mrf.mxu0 }
 0x259   :  { %v642_v19 = vadd.f32 %v641_v15, %v570_v14  ;;  %v662_v26 = vadd.f32 %v661_v16, %v571_v20 }
 0x25b   :  { %v746_v25 = vsub.f32 %v916_v44, %v642_v19  ;;  %v747_v36 = vsub.f32 %v927_v50, %v662_v26 }
 0x25d   :  { %v601_v21 = vpop.f32.mrf.mxu2  ;;  %v621_v22 = vpop.f32.mrf.mxu3  ;;  %v754_v35 = vmul.f32 %v746_v25, %v746_v25  ;;  %v755_v45 = vmul.f32 %v747_v36, %v747_v36 }
 0x25e   :  { %v602_v23 = vadd.f32 %v601_v21, %v568_v17  ;;  %v622_v24 = vadd.f32 %v621_v22, %v569_v18 }
 0x260   :  { %v744_v27 = vsub.f32 %v921_v49, %v602_v23  ;;  %v745_v28 = vsub.f32 %v933_v55, %v622_v24  ;;  %v721_v34 = vpop.f32.mrf.mxu1  ;;  %v741_v39 = vpop.f32.mrf.mxu0 }
 0x261   :  { %v722_v42 = vadd.f32 %v721_v34, %v574_v29  ;;  %v742_v55 = vadd.f32 %v741_v39, %v575_v38 }
 0x262   :  { %v752_v30 = vmul.f32 %v744_v27, %v744_v27  ;;  %v753_v31 = vmul.f32 %v745_v28, %v745_v28 }
 0x263   :  { %v750_v48 = vsub.f32 %v940_v0, %v722_v42  ;;  %v751_v54 = vsub.f32 %v950_v5, %v742_v55 }
 0x264   :  { %v760_v37 = vadd.f32 %v753_v31, %v752_v30 }
 0x265   :  { %v681_v40 = vpop.f32.mrf.mxu2  ;;  %v701_v41 = vpop.f32.mrf.mxu3  ;;  %v758_v56 = vmul.f32 %v750_v48, %v750_v48  ;;  %v759_v58 = vmul.f32 %v751_v54, %v751_v54 }
 0x266   :  { %v761_v44 = vadd.f32 %v760_v37, %v754_v35  ;;  %v682_v43 = vadd.f32 %v681_v40, %v572_v32  ;;  %v702_v49 = vadd.f32 %v701_v41, %v573_v33 }
 0x268   :  { %v748_v46 = vsub.f32 %v945_v4, %v682_v43  ;;  %v749_v47 = vsub.f32 %v959_v8, %v702_v49  ;;  %v762_v52 = vadd.f32 %v761_v44, %v755_v45  ;;  %v770_v4 = vmul.f32 1024.0, %v797_v62 }
 0x26a   :  { %v756_v51 = vmul.f32 %v748_v46, %v748_v46  ;;  %v757_v53 = vmul.f32 %v749_v47, %v749_v47  ;;  %v771_v63 = vsub.f32 1.0, %v770_v4 }
 0x26c   :  { %v763_v50 = vadd.f32 %v762_v52, %v756_v51  ;;  %v772_v8 = vmul.f32 %v797_v62, %v771_v63 }
 0x26e   :  { %v764_v57 = vadd.f32 %v763_v50, %v757_v53  ;;  %v773_v1 = vadd.f32 %v797_v62, %v772_v8 }
 0x270   :  { %v765_v59 = vadd.f32 %v764_v57, %v758_v56  ;;  %v775_v0 = vsel %vm774_vm1, %v797_v62, %v773_v1 }
 0x272   :  { %v766_v60 = vadd.f32 %v765_v59, %v759_v58 }
 0x274   :  { %767 = vadd.xlane.f32.xlu0 %v766_v60 }
 0x2e7   :  { %v768_v2 = vpop.xlane.xlu0 %767 }
 0x2e8   :  { %v776_v3 = vmul.f32 %v775_v0, %v768_v2 }
 0x2ea   :  { %778 = vst.msk [vmem:[%s1053_s9] sm:$0xff] %vm777_vm2, %v776_v3 }
 0x2eb   :  { %783 = vsyncpa [#allocation3], 1 }
 0x2ec   :  { %784 = vsyncpa [#allocation5], 1 }

</bundles_post_ra>
